<compile_context>
chip_gen: v7x
topology: tpu7x:2x2x1
jax: 0.10.0
libtpu: 0.0.40
codegen_flags: <defaults>
</compile_context>

<pallas_src>
import functools
import math

import jax
import jax.numpy as jnp
from jax.experimental import pallas as pl
from jax.experimental.pallas import tpu as pltpu


def _layer_norm_kernel(params_ref, x_ref, o_ref, *, eps, feature_dim):
    # All statistics in f32 regardless of input dtype.
    x = x_ref[...].astype(jnp.float32)
    mean = jnp.mean(x, axis=-1, keepdims=True)
    centered = x - mean
    # torch.Tensor.std defaults to the unbiased estimator (divide by N-1) and the
    # module adds eps to std (NOT to var). feature_dim == 1 yields NaN, matching
    # torch. Rows past the true row count in the final (padded) block compute
    # garbage statistics, but their writeback is masked, so valid rows are fine.
    var = jnp.sum(centered * centered, axis=-1, keepdims=True) / (feature_dim - 1)
    std = jnp.sqrt(var)
    # Per-row (tr, 1) exact reciprocal with alpha folded in; per-row means it is
    # essentially free and keeps tight numerical tolerance.
    scale = params_ref[0] / (std + eps)
    o_ref[...] = (centered * scale + params_ref[1]).astype(o_ref.dtype)


def _pick_tile_rows(rows, feature_dim, itemsize):
    """Adaptive row tile: ~2 MiB blocks, sublane-aligned, >=2 grid steps."""
    # Sublane packing: 4-byte dtypes -> 8 rows/vreg, 2-byte -> 16, 1-byte -> 32.
    sub = max(8, 32 // max(int(itemsize), 1))
    if rows <= sub:
        return rows  # full-extent block is always a legal BlockSpec
    # ~2 MiB input blocks amortize the ~0.35 us per-step overhead while keeping
    # 2x in + 2x out double buffers + f32 temps far under every generation's
    # scoped-VMEM default (16 MiB v5e / 32 MiB v6e,v7x).
    target_block_bytes = 2 * 1024 * 1024
    tr = target_block_bytes // max(feature_dim * itemsize, 1)
    tr = max(sub, (tr // sub) * sub)
    tr = min(tr, rows)
    if tr != rows:
        tr = max(sub, (tr // sub) * sub)
    # Guarantee >=2 grid steps so v7x's two TensorCores both get work under
    # dimension_semantics=("parallel",) and the BlockSpec pipeline has a real
    # prologue/epilogue to overlap DMA with compute.
    while pl.cdiv(rows, tr) < 2 and tr > sub:
        tr = max(sub, ((tr // 2) // sub) * sub)
    return tr


def layer_norm(x, alpha, bias, *, eps=1e-6):
    """x: [..., D]; alpha, bias: scalar learnable params (shape (1,) or ())."""
    orig_shape = x.shape
    D = orig_shape[-1]
    rows = math.prod(orig_shape[:-1])
    x2d = x.reshape(rows, D)
    itemsize = x.dtype.itemsize

    # TODO(synk): for production feature dims < 128, repack multiple rows per
    # 128-lane row (segmented reduction) to avoid masked vld/vst; not done here.
    tr = _pick_tile_rows(rows, D, itemsize)
    grid = (pl.cdiv(rows, tr),)

    # Conservative VMEM budget: 2x double-buffered input + 2x output blocks plus
    # headroom for the in-kernel f32 temporaries; capped at 32 MiB so it never
    # exceeds v7x's 64 MiB physical VMEM (and leaves slack on v5e/v6e).
    block_bytes = tr * D * itemsize
    f32_block = tr * D * 4
    vmem_needed = 4 * block_bytes + 4 * f32_block + (2 << 20)
    vmem_limit = int(min(max(vmem_needed, 8 << 20), 32 << 20))

    # [alpha, bias] packed into a tiny f32 array, scalar-prefetched into SMEM.
    params = jnp.concatenate(
        [jnp.asarray(alpha, jnp.float32).reshape(1),
         jnp.asarray(bias, jnp.float32).reshape(1)]
    )

    kernel = functools.partial(_layer_norm_kernel, eps=float(eps), feature_dim=D)

    out2d = pl.pallas_call(
        kernel,
        out_shape=jax.ShapeDtypeStruct((rows, D), x.dtype),
        grid_spec=pltpu.PrefetchScalarGridSpec(
            num_scalar_prefetch=1,
            grid=grid,
            in_specs=[pl.BlockSpec((tr, D), lambda i, params_ref: (i, 0))],
            out_specs=pl.BlockSpec((tr, D), lambda i, params_ref: (i, 0)),
        ),
        compiler_params=pltpu.CompilerParams(
            dimension_semantics=("parallel",),
            vmem_limit_bytes=vmem_limit,
        ),
        cost_estimate=pl.CostEstimate(
            flops=8 * rows * D,
            transcendentals=2 * rows,  # one sqrt + one reciprocal per row
            bytes_accessed=2 * rows * D * itemsize,
        ),
    )(params, x2d)

    return out2d.reshape(orig_shape)


if __name__ == "__main__":
    key = jax.random.PRNGKey(0)
    batch, seq, hidden = 2, 8, 32
    x = jax.random.normal(key, (batch, seq, hidden), jnp.float32)

    eps = 1e-6

    def ref_fn(x, a, b):
        mean = jnp.mean(x, axis=-1, keepdims=True)
        std = jnp.std(x, axis=-1, keepdims=True, ddof=1)  # unbiased, like torch
        return a * (x - mean) / (std + eps) + b

    # Module default init: alpha = ones(1), bias = zeros(1).
    alpha = jnp.ones((1,), jnp.float32)
    bias = jnp.zeros((1,), jnp.float32)
    out = layer_norm(x, alpha, bias, eps=eps)
    jax.block_until_ready(out)
    assert out.shape == x.shape
    assert jnp.allclose(out, ref_fn(x, alpha[0], bias[0]), atol=1e-4, rtol=1e-4)

    # Non-trivial scalar params (post-training values).
    alpha2 = jnp.array([1.3], jnp.float32)
    bias2 = jnp.array([-0.2], jnp.float32)
    out2 = layer_norm(x, alpha2, bias2, eps=eps)
    jax.block_until_ready(out2)
    assert jnp.allclose(out2, ref_fn(x, alpha2[0], bias2[0]), atol=1e-4, rtol=1e-4)

    # Shape where rows is not a multiple of the tile (masked final block).
    x3 = jax.random.normal(jax.random.PRNGKey(1), (3, 7, 32), jnp.float32)
    out3 = layer_norm(x3, alpha2, bias2, eps=eps)
    jax.block_until_ready(out3)
    assert jnp.allclose(out3, ref_fn(x3, alpha2[0], bias2[0]), atol=1e-4, rtol=1e-4)

    print("KERNEL_OK")
</pallas_src>

<mosaic_0001>
module attributes {stable_mosaic.version = 11 : i64} {
  func.func @_layer_norm_kernel(%arg0: i32, %arg1: memref<2xf32, #tpu.memory_space<smem>>, %arg2: memref<8x32xf32, #tpu.memory_space<vmem>>, %arg3: memref<8x32xf32, #tpu.memory_space<vmem>>) attributes {dimension_semantics = [#tpu.dimension_semantics<parallel>], iteration_bounds = array<i64: 2>, scalar_prefetch = 1 : i64, scratch_operands = 0 : i64, tpu.core_type = #tpu.core_type<tc>, window_params = [{transform_indices = @transform_0, window_bounds = array<i64: 8, 32>}, {transform_indices = @transform_1, window_bounds = array<i64: 8, 32>}]} {
    %c0 = arith.constant 0 : index
    %c0_0 = arith.constant 0 : index
    %0 = vector.load %arg2[%c0, %c0_0] : memref<8x32xf32, #tpu.memory_space<vmem>>, vector<8x32xf32>
    %cst = arith.constant dense<0.000000e+00> : vector<8xf32>
    %1 = vector.multi_reduction <add>, %0, %cst [1] : vector<8x32xf32> to vector<8xf32>
    %2 = vector.shape_cast %1 : vector<8xf32> to vector<8x1xf32>
    %cst_1 = arith.constant 3.200000e+01 : f32
    %3 = vector.broadcast %cst_1 : f32 to vector<8x1xf32>
    %4 = arith.divf %2, %3 : vector<8x1xf32>
    %5 = vector.broadcast %4 : vector<8x1xf32> to vector<8x32xf32>
    %6 = arith.subf %0, %5 : vector<8x32xf32>
    %7 = arith.mulf %6, %6 : vector<8x32xf32>
    %cst_2 = arith.constant dense<0.000000e+00> : vector<8xf32>
    %8 = vector.multi_reduction <add>, %7, %cst_2 [1] : vector<8x32xf32> to vector<8xf32>
    %9 = vector.shape_cast %8 : vector<8xf32> to vector<8x1xf32>
    %cst_3 = arith.constant 3.100000e+01 : f32
    %10 = vector.broadcast %cst_3 : f32 to vector<8x1xf32>
    %11 = arith.divf %9, %10 : vector<8x1xf32>
    %12 = math.sqrt %11 : vector<8x1xf32>
    %c0_4 = arith.constant 0 : index
    %13 = memref.load %arg1[%c0_4] : memref<2xf32, #tpu.memory_space<smem>>
    %cst_5 = arith.constant 9.99999997E-7 : f32
    %14 = vector.broadcast %cst_5 : f32 to vector<8x1xf32>
    %15 = arith.addf %12, %14 : vector<8x1xf32>
    %16 = vector.broadcast %13 : f32 to vector<8x1xf32>
    %17 = arith.divf %16, %15 : vector<8x1xf32>
    %18 = vector.broadcast %17 : vector<8x1xf32> to vector<8x32xf32>
    %19 = arith.mulf %6, %18 : vector<8x32xf32>
    %c1 = arith.constant 1 : index
    %20 = memref.load %arg1[%c1] : memref<2xf32, #tpu.memory_space<smem>>
    %21 = vector.broadcast %20 : f32 to vector<8x32xf32>
    %22 = arith.addf %19, %21 : vector<8x32xf32>
    %c0_6 = arith.constant 0 : index
    %c0_7 = arith.constant 0 : index
    %23 = vector.load %arg3[%c0_6, %c0_7] : memref<8x32xf32, #tpu.memory_space<vmem>>, vector<8x32xf32>
    tpu.vector_store %arg3[%c0_6, %c0_7], %22 {strides = array<i32>} : memref<8x32xf32, #tpu.memory_space<vmem>>, vector<8x32xf32>,
    return
  }
  func.func @transform_0(%arg0: i32, %arg1: memref<2xf32, #tpu.memory_space<smem>>) -> (i32, i32) {
    %c0_i32 = arith.constant 0 : i32
    %c0_i32_0 = arith.constant 0 : i32
    return %arg0, %c0_i32 : i32, i32
  }
  func.func @transform_1(%arg0: i32, %arg1: memref<2xf32, #tpu.memory_space<smem>>) -> (i32, i32) {
    %c0_i32 = arith.constant 0 : i32
    %c0_i32_0 = arith.constant 0 : i32
    return %arg0, %c0_i32 : i32, i32
  }
}

</mosaic_0001>

<bundles_post_ra>
// kernel: tpu_custom_call.1
= control target key start
LH: loop header
LB: loop body
LE: loop exit
PB: predicated region body
PF: predicated region fallthrough
CT: control target
= control target key end

     0   :  { %s624_s0 = inlined_call_operand.hbm [shape: f32[2], index: 0, kind: input, shape index: {}]   ;;  %s625_s1 = inlined_call_operand.hbm [shape: f32[16,32], index: 1, kind: input, shape index: {}]   ;;  %s626_s2 = inlined_call_operand.hbm [shape: f32[16,32], index: 2, kind: output, shape index: {}]  }
   0x1   :  { %s316_s11 = scalar_lea.hbm %s624_s0, 16 }
   0x2   :  { %p317_p0 = scmp.ne.s32.totalorder %s624_s0, %s316_s11  ;;  %p320_p1 = scmp.lt.u32.totalorder %s316_s11, %s624_s0 }
   0x4   :  { %p322_p2 = pnand %p320_p1, %p317_p0 }
   0x6   :  { %325 = shalt.err (!%p322_p2)  }
   0x7   :  { %s426_s16 = smov [#allocation3]  }
   0x8   :  { %8 = dma.hbm_to_smem %s624_s0, 16, %s426_s16, [#allocation2] }
   0x9   :  { %400 = dma.done.wait [#allocation2], 16 }
   0xa   :  { %401 = vsyncadd [#allocation2], 4294967280 }
   0xb   :  { %10 = sfence }
   0xc   :  { %11 = vsyncpa [#allocation5], 0 }
   0xd   :  { %13 = vsyncpa [#allocation5 + $0x1], 0 }
   0xe   :  { %14 = vsyncpa [#allocation6], 0 }
   0xf   :  { %16 = vsyncpa [#allocation6 + $0x1], 0  ;;  %s456_s19 = smov 0   ;;  %s458_s20 = smov 0  }
  0x10   :  { %s460_s21 = smov 0   ;;  %s462_s22 = smov 0  }
  0x11 LB: > { %s477_s0 = sadd.s32 4294967295, %s424_s22   ;;  %s252_s23 = sadd.s32 4294967294, %s424_s22   ;;  %s424_s22 = sphi %s462_s22, %s641_s22   ;;  %s420_s21 = sphi %s460_s21, %s640_s21   ;;  %s416_s20 = sphi %s458_s20, %s639_s20   ;;  %s412_s19 = sphi %s456_s19, %s638_s19  }
  0x12   : > { %s481_s24 = sadd.s32 1, %s424_s22   ;;  %s29_s25 = sadd.s32 1, %s420_s21 }
  0x13   : > { %s26_s26 = ssub.s32 %s424_s22, %s481_s24  ;;  %p36_p3 = scmp.ne.s32.totalorder %s420_s21, %s416_s20 }
  0x14   : > { %p27_p4 = scmp.eq.s32.totalorder %s26_s26, 0  ;;  %p37_p5 = scmp.eq.s32.totalorder %s424_s22, 0 }
  0x15   : > { %p42_p6 = scmp.ne.s32.totalorder %s416_s20, %s412_s19  ;;  %p43_p7 = scmp.eq.s32.totalorder %s477_s0, 0 }
  0x16   : > { %s493_s27 = scalar_select %p27_p4, %s420_s21, %s29_s25  }
  0x17   : > { %p495_p8 = por %p37_p5, %p36_p3  ;;  %p499_p9 = por %p43_p7, %p42_p6 }
  0x18   : > { %p66_p10 = scmp.eq.s32.totalorder %s477_s0, 1  ;;  %p72_p11 = scmp.eq.s32.totalorder %s252_s23, 1 }
  0x19   : > { %p277_p13 = scmp.lt.s32.totalorder %s424_s22, 2  ;;  %s92_s4 = sand.u32 1, %s420_s21  }
  0x1a   : > { %p506_p0 = por %p66_p10, %p36_p3  ;;  %p510_p1 = por %p72_p11, %p42_p6 }
  0x1b   : > { %s256_s5 = sshll.u32 %s424_s22, 7  ;;  %s255_s6 = sshll.u32 %s92_s4, 3 }
  0x1c   : > { %s630_s30 = scalar_select %p506_p0, 1, 0 }
  0x1d   : > { %s631_s3 = scalar_select %p510_p1, 1, 0 }
  0x1e   : > { %s519_s9 = scalar_lea.hbm %s625_s1, %s256_s5  ;;  %s96_s10 = scalar_lea.vmem [#allocation4], %s255_s6 }
  0x1f   : > { %s103_s11 = sshll.u32 %s96_s10, 4  ;;  %p523_p2 = pnand %p277_p13, %p495_p8  ;;  %s527_s11 = int_to_ptr.vmem [resolvable:$true] %s103_s11 }
  0x20   : > { %s93_s13 = scalar_lea.sflag [#allocation5], %s92_s4  ;;  %s326_s14 = scalar_lea.hbm %s519_s9, 128 }
  0x21   : > { %p327_p5 = scmp.ne.s32.totalorder %s519_s9, %s326_s14  ;;  %p328_p6 = pneg %p523_p2 }
  0x22   : > { %s331_s17 = scalar_lea.hbm %s625_s1, 256  ;;  %p332_p8 = scmp.lt.u32.totalorder %s519_s9, %s625_s1 }
  0x23   : > { %p329_p7 = pnand %p328_p6, %p327_p5  ;;  %p333_p11 = scmp.lt.u32.totalorder %s331_s17, %s326_s14 }
  0x24   : > { %p335_p12 = scmp.lt.u32.totalorder %s326_s14, %s519_s9 }
  0x25   : > { %p330_p10 = pneg %p329_p7  ;;  %p334_p13 = por %p333_p11, %p332_p8 }
  0x27   : > { %p336_p3 = por %p335_p12, %p334_p13 }
  0x29   : > { %p337_p4 = pnand %p336_p3, %p330_p10 }
  0x2b   : > { %340 = shalt.err (!%p337_p4)
}
  0x2c   : > { %s341_s25 = scalar_lea.vmem %s527_s11, 128  ;;  %s427_s26 = smov [#allocation4]  }
  0x2d   : > { %p342_p5 = scmp.ne.s32.totalorder %s527_s11, %s341_s25  ;;  %s346_s28 = sshll.u32 %s427_s26, 4  ;;  %s347_s28 = int_to_ptr.vmem [resolvable:$false] %s346_s28 }
  0x2e   : > { %s348_s4 = scalar_lea.vmem %s347_s28, 256  ;;  %p349_p0 = scmp.lt.s32.totalorder %s527_s11, %s347_s28 }
  0x2f   : > { %p344_p7 = pnand %p342_p5, %p328_p6  ;;  %p350_p8 = scmp.lt.s32.totalorder %s348_s4, %s341_s25 }
  0x31   : > { %p345_p1 = pneg %p344_p7  ;;  %p351_p11 = por %p350_p8, %p349_p0 }
  0x33   : > { %p352_p12 = pnand %p351_p11, %p345_p1 }
  0x35   : > { %355 = shalt.err (!%p352_p12)
}
  0x36   : > { %272 = dma.hbm_to_vmem [thread:$0]  (!%p523_p2), %s519_s9, 128, %s527_s11, %s93_s13  }
  0x37   : > { %p633_p3 = scmp.lt.s32.totalorder %s424_s22, 3  ;;  %p634_p4 = scmp.ge.s32.totalorder %s424_s22, 1 }
  0x39   : > { %p109_p6 = pnand %p634_p4, %p633_p3 }
  0x3a   : > { %s561_s5 = sand.u32 (!%p109_p6), 1, %s416_s20  }
  0x3b   : > { %112 = sbr.rel (%p109_p6) target bundleno = 410 (0x19a), region = 24  ;;  %s258_s6 = sshll.u32 (!%p109_p6), %s561_s5, 3 }
  0x3c   : > { %s115_s7 = scalar_lea.sflag (!%p109_p6), [#allocation5], %s561_s5  ;;  %s118_s8 = scalar_lea.vmem (!%p109_p6), [#allocation4], %s258_s6 }
  0x42   : > { %403 = dma.done.wait (%p499_p9), %s115_s7, 128  }
  0x43   : > { %405 = vsyncadd (%p499_p9), %s115_s7, 4294967168  ;;  %vm138_vm0 = vcmask 261120   ;;  %v137_v0 = vld [vmem:[%s118_s8] sm:$0xff]  ;;  %s158_s29 = sld [smem:[#allocation3]]  ;;  %s260_s9 = sld [smem:[#allocation3 + $0x1]] }
  0x44   : > { %v139_v1 = vsel %vm138_vm0, %v137_v0, 0.0  ;;  %s262_s10 = sshll.u32 %s477_s0, 7  ;;  %s136_s11 = scalar_lea.vmem [#allocation7], %s258_s6 }
  0x45   : > { %140 = vadd.xlane.f32.xlu0 %v139_v1  ;;  %s182_s12 = sshll.u32 %s136_s11, 4  ;;  %s579_s15 = scalar_lea.hbm %s626_s2, %s262_s10  ;;  %s581_s12 = int_to_ptr.vmem [resolvable:$true] %s182_s12 }
  0x46   : > { %s169_s16 = scalar_lea.sflag [#allocation6], %s561_s5  ;;  %s356_s17 = scalar_lea.vmem %s581_s12, 128 }
  0x47   : > { %p357_p9 = scmp.ne.s32.totalorder %s581_s12, %s356_s17  ;;  %p635_p0 = scmp.ne.s32.totalorder %s630_s30, 0 }
  0x48   : > { %s428_s0 = smov [#allocation7]  }
  0x49   : > { %v160_v15 = vstv %s158_s29  ;;  %v165_v18 = vstv %s260_s9  ;;  %p358_p1 = pnand %p357_p9, %p635_p0  ;;  %s360_s18 = sshll.u32 %s428_s0, 4  ;;  %s361_s18 = int_to_ptr.vmem [resolvable:$false] %s360_s18 }
  0x4a   : > { %s362_s23 = scalar_lea.vmem %s361_s18, 256  ;;  %p363_p10 = scmp.lt.s32.totalorder %s581_s12, %s361_s18 }
  0x4b   : > { %p359_p2 = pneg %p358_p1  ;;  %p364_p13 = scmp.lt.s32.totalorder %s362_s23, %s356_s17 }
  0x4d   : > { %p365_p5 = por %p364_p13, %p363_p10 }
  0x4f   : > { %p366_p7 = pnand %p365_p5, %p359_p2 }
  0xd2   : > { %v141_v2 = vpop.xlane.xlu0 %140 }
  0xd3   : > { %v143_v3 = vmul.f32 0.03125, %v141_v2 }
  0xd5   : > { %v144_v4 = vsub.f32 %v137_v0, %v143_v3 }
  0xd7   : > { %v145_v5 = vmul.f32 %v144_v4, %v144_v4 }
  0xd9   : > { %v146_v6 = vsel %vm138_vm0, %v145_v5, 0.0 }
  0xda   : > { %147 = vadd.xlane.f32.xlu0 %v146_v6 }
 0x167   : > { %v148_v7 = vpop.xlane.xlu0 %147 }
 0x168   : > { %v150_v8 = vmul.f32 0.032258064, %v148_v7 }
 0x16a   : > { %312 = vrsqrt.f32 %v150_v8  ;;  %vm153_vm1 = vcmp.eq.f32.partialorder %v150_v8, inf  ;;  %v156_v11 = vand.u32 2147483648, %v150_v8  ;;  %vm155_vm2 = vcmp.eq.f32.partialorder %v150_v8, 0.0 }
 0x174   : > { %v313_v9 = vpop.eup %312 }
 0x175   : > { %v152_v10 = vmul.f32 %v313_v9, %v150_v8 }
 0x177   : > { %v154_v12 = vsel %vm153_vm1, %v150_v8, %v152_v10 }
 0x178   : > { %v157_v13 = vsel %vm155_vm2, %v156_v11, %v154_v12 }
 0x179   : > { %v159_v14 = vadd.f32 1e-06, %v157_v13 }
 0x17b   : > { %314 = vrcp.f32 %v159_v14 }
 0x185   : > { %v315_v16 = vpop.eup %314 }
 0x186   : > { %v162_v17 = vmul.f32 %v315_v16, %v160_v15 }
 0x188   : > { %v163_v19 = vmul.f32 %v162_v17, %v144_v4 }
 0x18a   : > { %v166_v20 = vadd.f32 %v165_v18, %v163_v19 }
 0x18c   : > { %167 = vst.msk [vmem:[%s136_s11] sm:$0xff] %vm138_vm0, %v166_v20 }
 0x18d   : > { %369 = shalt.err (!%p366_p7)
}
 0x18e   : > { %s370_s25 = scalar_lea.hbm %s579_s15, 128  ;;  %s374_s4 = scalar_lea.hbm %s626_s2, 256 }
 0x18f   : > { %p371_p8 = scmp.ne.s32.totalorder %s579_s15, %s370_s25  ;;  %p375_p3 = scmp.lt.u32.totalorder %s579_s15, %s626_s2 }
 0x190   : > { %p376_p4 = scmp.lt.u32.totalorder %s374_s4, %s370_s25  ;;  %p378_p9 = scmp.lt.u32.totalorder %s370_s25, %s579_s15 }
 0x191   : > { %p372_p11 = pnand %p371_p8, %p635_p0 }
 0x192   : > { %p377_p6 = por %p376_p4, %p375_p3 }
 0x193   : > { %p373_p12 = pneg %p372_p11 }
 0x194   : > { %p379_p1 = por %p378_p9, %p377_p6 }
 0x196   : > { %p380_p2 = pnand %p379_p1, %p373_p12 }
 0x198   : > { %383 = shalt.err (!%p380_p2)
}
 0x199   : > { %267 = dma.vmem_to_hbm [thread:$0]  (%p635_p0), %s581_s12, 128, %s579_s15, %s169_s16  }
 0x19a PF: > { %s194_s7 = sand.u32 1, %s412_s19   ;;  %p636_p10 = scmp.ne.s32.totalorder %s631_s3, 0 }
 0x19b   : > { %p637_p13 = scmp.ge.s32.totalorder %s424_s22, 2  ;;  %s195_s8 = scalar_lea.sflag [#allocation6], %s194_s7 }
 0x19d   : > { %p274_p5 = pnand %p637_p13, %p636_p10 }
 0x19f   : > { %407 = dma.done.wait (!%p274_p5), %s195_s8, 128  }
 0x1a0   : > { %409 = vsyncadd (!%p274_p5), %s195_s8, 4294967168  ;;  %p19_p7 = scmp.ge.s32.totalorder %s481_s24, 4   ;;  %s638_s19 = smov %s416_s20 }
 0x1a1   : > { %s639_s20 = smov %s420_s21  ;;  %s640_s21 = smov %s493_s27 }
 0x1a2   : > { %s641_s22 = smov %s481_s24  ;;  %21 = sbr.rel (!%p19_p7) target bundleno = 17 (0x11), region = 69 }
 0x1a9   :  { %200 = vsyncpa [#allocation5], 1 }
 0x1aa   :  { %202 = vsyncpa [#allocation5 + $0x1], 1 }
 0x1ab   :  { %203 = vsyncpa [#allocation6], 1 }
 0x1ac   :  { %205 = vsyncpa [#allocation6 + $0x1], 1 }

</bundles_post_ra>
